<compile_context>
chip_gen: v5e
topology: v5e:2x2
jax: 0.10.0
libtpu: 0.0.40
codegen_flags: <defaults>
</compile_context>

<pallas_src>
import functools

import jax
import jax.numpy as jnp
from jax.experimental import pallas as pl
from jax.experimental.pallas import tpu as pltpu


def _round_up(x: int, m: int) -> int:
    return ((x + m - 1) // m) * m


def _dense_forward(z, w1, b1, w2, b2, return_logit):
    """Plain fused XLA forward (reference / small-N fallback / <pack tail)."""
    hid = jnp.maximum(jnp.dot(z, w1) + b1, 0.0)
    logit = jnp.dot(hid, w2)[:, 0] + b2[0]
    return logit if return_logit else jax.nn.sigmoid(logit)


def _termination_kernel(z_ref, w1_ref, b1_ref, w2_ref, b2_ref, out_ref, *,
                        pack: int, hidden: int, return_logit: bool):
    # Layer 1 on the MXU: (TP, pack*F) @ (pack*F, pack*H), f32 accumulation.
    h = jnp.dot(z_ref[...], w1_ref[...], preferred_element_type=jnp.float32)
    h = jnp.maximum(h + b1_ref[...], 0.0)                 # (TP, pack*H) f32 VPU

    # Layer 2 (H -> 1) per packed segment: VPU multiply with the tiled w2 row,
    # then a lane reduction per 128-lane segment.  Each segment is exactly one
    # vreg column, so the static slices are free and the reduce stays on XLU
    # (which has slack next to the MXU-bound layer 1).
    hw = h * w2_ref[...]                                   # (TP, pack*H) f32 VPU
    segs = [jnp.sum(hw[:, r * hidden:(r + 1) * hidden], axis=-1, keepdims=True)
            for r in range(pack)]                          # pack x (TP, 1)
    logit = jnp.concatenate(segs, axis=-1) + b2_ref[0]     # (TP, pack), b2 in SMEM

    if not return_logit:
        logit = jax.nn.sigmoid(logit)                      # f32, EUP
    out_ref[...] = logit.astype(out_ref.dtype)


def _pallas_forward(z, w1, b1, w2, b2, *, return_logit, use_bf16, tile_rows):
    """Pallas path; requires n % pack == 0 (n may still be ragged wrt the tile)."""
    n, f = z.shape
    hid = w1.shape[1]

    pack = 128 // f if (0 < f <= 128 and 128 % f == 0) else 1
    assert n % pack == 0
    p_rows = n // pack
    k = pack * f

    # Free, contiguous reshape: packed row i = logical rows [i*pack, (i+1)*pack).
    z_packed = z.reshape(p_rows, k)

    # Block-diagonal first-layer weight so one 128-lane packed row produces the
    # `pack` hidden vectors side by side; stays VMEM-resident (<= 256 KiB f32).
    w1_use = jnp.kron(jnp.eye(pack, dtype=w1.dtype), w1) if pack > 1 else w1
    b1_row = jnp.tile(b1.astype(jnp.float32), pack).reshape(1, pack * hid)
    w2_row = jnp.tile(w2[:, 0].astype(jnp.float32), pack).reshape(1, pack * hid)
    b2_s = b2.astype(jnp.float32)

    if use_bf16:
        z_in = z_packed.astype(jnp.bfloat16)
        w1_in = w1_use.astype(jnp.bfloat16)
    else:
        z_in = z_packed.astype(jnp.float32)
        w1_in = w1_use.astype(jnp.float32)

    # Packed-row tile: big (amortizes the ~0.35us/grid-step overhead), a
    # multiple of 8, and collapsed to the full extent when it fits one step.
    tile_p = max(8, _round_up(max(tile_rows // pack, 1), 8))
    if p_rows <= tile_p:
        tile_p = p_rows                      # full-extent block (always legal)
    num_tiles = pl.cdiv(p_rows, tile_p)      # ragged last block handled by Pallas

    in_itemsize = 2 if use_bf16 else 4
    cost = pl.CostEstimate(
        flops=2 * n * f * hid + 4 * n * hid,
        transcendentals=0 if return_logit else n,
        bytes_accessed=(n * f * in_itemsize + k * pack * hid * in_itemsize
                        + 2 * pack * hid * 4 + 4 + n * 4),
    )

    kernel = functools.partial(_termination_kernel, pack=pack, hidden=hid,
                               return_logit=return_logit)

    out = pl.pallas_call(
        kernel,
        out_shape=jax.ShapeDtypeStruct((p_rows, pack), jnp.float32),
        grid=(num_tiles,),
        in_specs=[
            pl.BlockSpec((tile_p, k), lambda i: (i, 0)),         # Z tiles stream
            pl.BlockSpec((k, pack * hid), lambda i: (0, 0)),     # W1 resident
            pl.BlockSpec((1, pack * hid), lambda i: (0, 0)),     # b1 resident
            pl.BlockSpec((1, pack * hid), lambda i: (0, 0)),     # w2 row resident
            pl.BlockSpec(memory_space=pltpu.MemorySpace.SMEM),   # b2 scalar
        ],
        out_specs=pl.BlockSpec((tile_p, pack), lambda i: (i, 0)),
        compiler_params=pltpu.CompilerParams(
            dimension_semantics=("parallel",)),                  # megacore on v7x
        cost_estimate=cost,
    )(z_in, w1_in, b1_row, w2_row, b2_s)

    # (p_rows, pack) row-major flatten restores the original row order for free.
    return out.reshape(n)


@functools.partial(jax.jit, static_argnames=("return_logit", "use_bf16",
                                             "tile_rows", "min_pallas_rows"))
def termination_prediction(z_core, w1, b1, w2, b2, *, return_logit=False,
                           use_bf16=True, tile_rows=16384,
                           min_pallas_rows=1024):
    """Forward of TerminationPredictionModel.

    z_core: (N, F) f32;  w1: (F, H);  b1: (H,);  w2: (H, 1);  b2: (1,)
    Returns (N,) f32 probabilities (or logits if return_logit=True).

    use_bf16=True (default) feeds Z/W1 to the MXU in bf16 with f32 accumulation
    and f32 bias/relu/sigmoid: ~2x less HBM traffic and native MXU speed at the
    cost of ~1e-2 relative logit error.  Pass use_bf16=False for full f32.
    """
    n, f = z_core.shape
    hid = w1.shape[1]
    assert w1.shape == (f, hid)
    assert b1.shape == (hid,)
    assert w2.shape == (hid, 1)
    assert b2.shape == (1,)

    # Small batches (the module's typical N ~ 8): a fused XLA expression beats
    # the fixed pallas_call launch/DMA latency.
    if n < min_pallas_rows:
        return _dense_forward(z_core.astype(jnp.float32), w1, b1, w2, b2,
                              return_logit)

    pack = 128 // f if (0 < f <= 128 and 128 % f == 0) else 1
    n_main = (n // pack) * pack
    n_tail = n - n_main

    pieces = []
    if n_main > 0:
        # No full-array zero-pad: when N is pack-aligned this is the original
        # buffer; otherwise only the < pack-row tail is split off.
        z_main = z_core if n_tail == 0 else z_core[:n_main]
        pieces.append(_pallas_forward(z_main, w1, b1, w2, b2,
                                      return_logit=return_logit,
                                      use_bf16=use_bf16, tile_rows=tile_rows))
    if n_tail > 0:
        # Tail of < pack rows finished in plain XLA (cheaper than padding or a
        # second kernel launch).
        pieces.append(_dense_forward(z_core[n_main:].astype(jnp.float32),
                                     w1, b1, w2, b2, return_logit))
    return pieces[0] if len(pieces) == 1 else jnp.concatenate(pieces)


if __name__ == "__main__":
    # Shapes consistent with the module: core_graph_vector_dim=32, hidden_dim=128.
    N, F, H = 8, 32, 128

    key = jax.random.PRNGKey(0)
    k_z, k_w1, k_b1, k_w2, k_b2, k_z2 = jax.random.split(key, 6)

    z_core = jax.random.normal(k_z, (N, F), dtype=jnp.float32)
    w1 = jax.random.normal(k_w1, (F, H), dtype=jnp.float32) * (1.0 / jnp.sqrt(F))
    b1 = jax.random.normal(k_b1, (H,), dtype=jnp.float32) * 0.01
    w2 = jax.random.normal(k_w2, (H, 1), dtype=jnp.float32) * (1.0 / jnp.sqrt(H))
    b2 = jax.random.normal(k_b2, (1,), dtype=jnp.float32) * 0.01

    ref_p = _dense_forward(z_core, w1, b1, w2, b2, False)
    ref_l = _dense_forward(z_core, w1, b1, w2, b2, True)

    # Pallas path, full f32 (min_pallas_rows=0 forces the kernel at small N).
    probs = termination_prediction(z_core, w1, b1, w2, b2, use_bf16=False,
                                   min_pallas_rows=0)
    logits = termination_prediction(z_core, w1, b1, w2, b2, return_logit=True,
                                    use_bf16=False, min_pallas_rows=0)
    jax.block_until_ready((probs, logits))
    assert probs.shape == (N,) and logits.shape == (N,)
    assert jnp.allclose(probs, ref_p, atol=1e-4, rtol=1e-4)
    assert jnp.allclose(logits, ref_l, atol=1e-4, rtol=1e-4)

    # Default bf16 fast path (looser tolerance: bf16 inputs, f32 accumulation).
    probs_bf16 = termination_prediction(z_core, w1, b1, w2, b2, min_pallas_rows=0)
    jax.block_until_ready(probs_bf16)
    assert jnp.allclose(probs_bf16, ref_p, atol=5e-2, rtol=5e-2)

    # Ragged N: multi-step grid with a partial last block (no zero-pad) plus a
    # 1-row XLA tail (301 % 4 == 1).
    N2 = 301
    z2 = jax.random.normal(k_z2, (N2, F), dtype=jnp.float32)
    ref2 = _dense_forward(z2, w1, b1, w2, b2, False)
    p2 = termination_prediction(z2, w1, b1, w2, b2, use_bf16=False,
                                min_pallas_rows=0, tile_rows=128)
    p2_bf16 = termination_prediction(z2, w1, b1, w2, b2, min_pallas_rows=0,
                                     tile_rows=128)
    jax.block_until_ready((p2, p2_bf16))
    assert p2.shape == (N2,)
    assert jnp.allclose(p2, ref2, atol=1e-4, rtol=1e-4)
    assert jnp.allclose(p2_bf16, ref2, atol=5e-2, rtol=5e-2)

    # Small-N fallback (default min_pallas_rows) stays consistent.
    p_fb = termination_prediction(z_core, w1, b1, w2, b2, use_bf16=False)
    jax.block_until_ready(p_fb)
    assert jnp.allclose(p_fb, ref_p, atol=1e-5, rtol=1e-5)

    print("KERNEL_OK")
</pallas_src>

<mosaic_0001>
module attributes {stable_mosaic.version = 11 : i64} {
  func.func @_termination_kernel(%arg0: i32, %arg1: memref<2x128xf32, #tpu.memory_space<vmem>>, %arg2: memref<128x512xf32, #tpu.memory_space<vmem>>, %arg3: memref<1x512xf32, #tpu.memory_space<vmem>>, %arg4: memref<1x512xf32, #tpu.memory_space<vmem>>, %arg5: memref<1xf32, #tpu.memory_space<smem>>, %arg6: memref<2x4xf32, #tpu.memory_space<vmem>>) attributes {dimension_semantics = [#tpu.dimension_semantics<parallel>], iteration_bounds = array<i64: 1>, scalar_prefetch = 0 : i64, scratch_operands = 0 : i64, tpu.core_type = #tpu.core_type<tc>, window_params = [{transform_indices = @transform_0, window_bounds = array<i64: 2, 128>}, {pipeline_mode = #tpu.pipeline_mode<synchronous>, transform_indices = @transform_1, window_bounds = array<i64: 128, 512>}, {pipeline_mode = #tpu.pipeline_mode<synchronous>, transform_indices = @transform_2, window_bounds = array<i64: 1, 512>}, {pipeline_mode = #tpu.pipeline_mode<synchronous>, transform_indices = @transform_3, window_bounds = array<i64: 1, 512>}, {transform_indices = @transform_4, window_bounds = array<i64: 1>}, {transform_indices = @transform_5, window_bounds = array<i64: 2, 4>}]} {
    %c0 = arith.constant 0 : index
    %c0_0 = arith.constant 0 : index
    %0 = vector.load %arg1[%c0, %c0_0] : memref<2x128xf32, #tpu.memory_space<vmem>>, vector<2x128xf32>
    %c0_1 = arith.constant 0 : index
    %c0_2 = arith.constant 0 : index
    %1 = vector.load %arg2[%c0_1, %c0_2] : memref<128x512xf32, #tpu.memory_space<vmem>>, vector<128x512xf32>
    %cst = arith.constant dense<0.000000e+00> : vector<2x512xf32>
    %2 = tpu.matmul %0, %1, %cst {dimension_numbers = #tpu.dot_dimension_numbers<[1], [0], [0], [1], [0, 0, 1, 1], [], []>} : vector<2x128xf32>, vector<128x512xf32>, vector<2x512xf32> -> vector<2x512xf32>
    %c0_3 = arith.constant 0 : index
    %c0_4 = arith.constant 0 : index
    %3 = vector.load %arg3[%c0_3, %c0_4] : memref<1x512xf32, #tpu.memory_space<vmem>>, vector<1x512xf32>
    %4 = vector.broadcast %3 : vector<1x512xf32> to vector<2x512xf32>
    %5 = arith.addf %2, %4 : vector<2x512xf32>
    %cst_5 = arith.constant 0.000000e+00 : f32
    %6 = vector.broadcast %cst_5 : f32 to vector<2x512xf32>
    %7 = arith.maximumf %5, %6 : vector<2x512xf32>
    %c0_6 = arith.constant 0 : index
    %c0_7 = arith.constant 0 : index
    %8 = vector.load %arg4[%c0_6, %c0_7] : memref<1x512xf32, #tpu.memory_space<vmem>>, vector<1x512xf32>
    %9 = vector.broadcast %8 : vector<1x512xf32> to vector<2x512xf32>
    %10 = arith.mulf %7, %9 : vector<2x512xf32>
    %11 = vector.extract_strided_slice %10 {offsets = [0, 0], sizes = [2, 128], strides = [1, 1]} : vector<2x512xf32> to vector<2x128xf32>
    %cst_8 = arith.constant dense<0.000000e+00> : vector<2xf32>
    %12 = vector.multi_reduction <add>, %11, %cst_8 [1] : vector<2x128xf32> to vector<2xf32>
    %13 = vector.shape_cast %12 : vector<2xf32> to vector<2x1xf32>
    %14 = vector.extract_strided_slice %10 {offsets = [0, 128], sizes = [2, 128], strides = [1, 1]} : vector<2x512xf32> to vector<2x128xf32>
    %cst_9 = arith.constant dense<0.000000e+00> : vector<2xf32>
    %15 = vector.multi_reduction <add>, %14, %cst_9 [1] : vector<2x128xf32> to vector<2xf32>
    %16 = vector.shape_cast %15 : vector<2xf32> to vector<2x1xf32>
    %17 = vector.extract_strided_slice %10 {offsets = [0, 256], sizes = [2, 128], strides = [1, 1]} : vector<2x512xf32> to vector<2x128xf32>
    %cst_10 = arith.constant dense<0.000000e+00> : vector<2xf32>
    %18 = vector.multi_reduction <add>, %17, %cst_10 [1] : vector<2x128xf32> to vector<2xf32>
    %19 = vector.shape_cast %18 : vector<2xf32> to vector<2x1xf32>
    %20 = vector.extract_strided_slice %10 {offsets = [0, 384], sizes = [2, 128], strides = [1, 1]} : vector<2x512xf32> to vector<2x128xf32>
    %cst_11 = arith.constant dense<0.000000e+00> : vector<2xf32>
    %21 = vector.multi_reduction <add>, %20, %cst_11 [1] : vector<2x128xf32> to vector<2xf32>
    %22 = vector.shape_cast %21 : vector<2xf32> to vector<2x1xf32>
    %23 = tpu.concatenate %13, %16, %19, %22 in 1 : vector<2x1xf32>, vector<2x1xf32>, vector<2x1xf32>, vector<2x1xf32> -> vector<2x4xf32>
    %c0_12 = arith.constant 0 : index
    %24 = memref.load %arg5[%c0_12] : memref<1xf32, #tpu.memory_space<smem>>
    %25 = vector.broadcast %24 : f32 to vector<2x4xf32>
    %26 = arith.addf %23, %25 : vector<2x4xf32>
    %27 = arith.negf %26 : vector<2x4xf32>
    %28 = math.exp %27 : vector<2x4xf32>
    %cst_13 = arith.constant 1.000000e+00 : f32
    %29 = vector.broadcast %cst_13 : f32 to vector<2x4xf32>
    %30 = arith.addf %29, %28 : vector<2x4xf32>
    %31 = arith.divf %29, %30 : vector<2x4xf32>
    %c0_14 = arith.constant 0 : index
    %c0_15 = arith.constant 0 : index
    %32 = vector.load %arg6[%c0_14, %c0_15] : memref<2x4xf32, #tpu.memory_space<vmem>>, vector<2x4xf32>
    tpu.vector_store %arg6[%c0_14, %c0_15], %31 {strides = array<i32>} : memref<2x4xf32, #tpu.memory_space<vmem>>, vector<2x4xf32>,
    return
  }
  func.func @transform_0(%arg0: i32) -> (i32, i32) {
    %c0_i32 = arith.constant 0 : i32
    %c0_i32_0 = arith.constant 0 : i32
    return %arg0, %c0_i32 : i32, i32
  }
  func.func @transform_1(%arg0: i32) -> (i32, i32) {
    %c0_i32 = arith.constant 0 : i32
    %c0_i32_0 = arith.constant 0 : i32
    %c0_i32_1 = arith.constant 0 : i32
    return %c0_i32, %c0_i32_0 : i32, i32
  }
  func.func @transform_2(%arg0: i32) -> (i32, i32) {
    %c0_i32 = arith.constant 0 : i32
    %c0_i32_0 = arith.constant 0 : i32
    %c0_i32_1 = arith.constant 0 : i32
    return %c0_i32, %c0_i32_0 : i32, i32
  }
  func.func @transform_3(%arg0: i32) -> (i32, i32) {
    %c0_i32 = arith.constant 0 : i32
    %c0_i32_0 = arith.constant 0 : i32
    %c0_i32_1 = arith.constant 0 : i32
    return %c0_i32, %c0_i32_0 : i32, i32
  }
  func.func @transform_4(%arg0: i32) -> i32 {
    %c0_i32 = arith.constant 0 : i32
    %c0_i32_0 = arith.constant 0 : i32
    return %c0_i32 : i32
  }
  func.func @transform_5(%arg0: i32) -> (i32, i32) {
    %c0_i32 = arith.constant 0 : i32
    %c0_i32_0 = arith.constant 0 : i32
    return %arg0, %c0_i32 : i32, i32
  }
}

</mosaic_0001>

<bundles_post_ra>
// kernel: tile.12
= control target key start
LH: loop header
LB: loop body
LE: loop exit
PB: predicated region body
PF: predicated region fallthrough
CT: control target
= control target key end

     0   :  { %s22_s0 = inlined_call_operand.vmem [shape: f32[128], index: 0, kind: input, shape index: {}]   ;;  %s23_s1 = inlined_call_operand.vmem [shape: f32[4,128], index: 1, kind: output, shape index: {}]  }
   0x1   :  { %v4_v0 = vld [vmem:[%s22_s0] ss:$0 sm:$0xff] }
   0x2   :  { %5 = vst [vmem:[%s23_s1] sm:$0xf] %v4_v0 }

// kernel: termination_prediction.1
= control target key start
LH: loop header
LB: loop body
LE: loop exit
PB: predicated region body
PF: predicated region fallthrough
CT: control target
= control target key end

     0   :  { %vm194_vm0 = vcmask 1041408   ;;  %vm207_vm1 = vcmask 7168   ;;  %vm209_vm2 = vcmask 15360   ;;  %vm211_vm3 = vcmask 23552   ;;  %s487_s1 = inlined_call_operand.vmem [shape: f32[128,512], index: 1, kind: input, shape index: {}]   ;;  %s488_s0 = inlined_call_operand.vmem [shape: f32[2,128], index: 0, kind: input, shape index: {}]   ;;  %s489_s2 = inlined_call_operand.vmem [shape: f32[1,512], index: 2, kind: input, shape index: {}]   ;;  %s490_s3 = inlined_call_operand.vmem [shape: f32[1,512], index: 3, kind: input, shape index: {}]   ;;  %s491_s4 = inlined_call_operand.<no memory space> [shape: f32[1], index: 4, kind: input, shape index: {}]   ;;  %s492_s5 = inlined_call_operand.vmem [shape: f32[2,4], index: 5, kind: output, shape index: {}]  }
   0x1   :  { %v82_v0 = vld [vmem:[%s487_s1 + $0x1e0] sm:$0xff]  ;;  %v84_v1 = vld [vmem:[%s487_s1 + $0x1f0] sm:$0xff]  ;;  %v83_v6 = vld [vmem:[%s487_s1 + $0x1e8] sm:$0xff]  ;;  %vm235_vm6 = vcmask 25600  }
   0x2   :  { %v78_v2 = vld [vmem:[%s487_s1 + $0x1c0] sm:$0xff]  ;;  %96 = vmatpush.msra.mxu0 %v82_v0  ;;  %136 = vmatpush.msra.mxu2 %v84_v1  ;;  %v80_v3 = vld [vmem:[%s487_s1 + $0x1d0] sm:$0xff]  ;;  %v85_v7 = vld [vmem:[%s487_s1 + $0x1f8] sm:$0xff] }
   0x3   :  { %v74_v4 = vld [vmem:[%s487_s1 + $0x1a0] sm:$0xff]  ;;  %v76_v5 = vld [vmem:[%s487_s1 + $0x1b0] sm:$0xff]  ;;  %116 = vmatpush.msra.mxu1 %v83_v6  ;;  %156 = vmatpush.msra.mxu3 %v85_v7  ;;  %v79_v10 = vld [vmem:[%s487_s1 + $0x1c8] sm:$0xff] }
   0x4   :  { %97 = vmatpush.msra.mxu0 %v78_v2  ;;  %137 = vmatpush.msra.mxu2 %v80_v3  ;;  %v70_v8 = vld [vmem:[%s487_s1 + $0x180] sm:$0xff]  ;;  %v72_v9 = vld [vmem:[%s487_s1 + $0x190] sm:$0xff]  ;;  %v81_v11 = vld [vmem:[%s487_s1 + $0x1d8] sm:$0xff] }
   0x5   :  { %v75_v12 = vld [vmem:[%s487_s1 + $0x1a8] sm:$0xff]  ;;  %v66_v13 = vld [vmem:[%s487_s1 + $0x160] sm:$0xff]  ;;  %v68_v14 = vld [vmem:[%s487_s1 + $0x170] sm:$0xff]  ;;  %117 = vmatpush.msra.mxu1 %v79_v10  ;;  %157 = vmatpush.msra.mxu3 %v81_v11 }
   0x6   :  { %98 = vmatpush.msra.mxu0 %v74_v4  ;;  %138 = vmatpush.msra.mxu2 %v76_v5  ;;  %v77_v15 = vld [vmem:[%s487_s1 + $0x1b8] sm:$0xff]  ;;  %v71_v16 = vld [vmem:[%s487_s1 + $0x188] sm:$0xff]  ;;  %v62_v18 = vld [vmem:[%s487_s1 + $0x140] sm:$0xff] }
   0x7   :  { %v73_v17 = vld [vmem:[%s487_s1 + $0x198] sm:$0xff]  ;;  %v64_v19 = vld [vmem:[%s487_s1 + $0x150] sm:$0xff]  ;;  %118 = vmatpush.msra.mxu1 %v75_v12  ;;  %158 = vmatpush.msra.mxu3 %v77_v15  ;;  %v67_v20 = vld [vmem:[%s487_s1 + $0x168] sm:$0xff] }
   0x8   :  { %99 = vmatpush.msra.mxu0 %v70_v8  ;;  %139 = vmatpush.msra.mxu2 %v72_v9  ;;  %v69_v21 = vld [vmem:[%s487_s1 + $0x178] sm:$0xff]  ;;  %v58_v22 = vld [vmem:[%s487_s1 + $0x120] sm:$0xff]  ;;  %v60_v23 = vld [vmem:[%s487_s1 + $0x130] sm:$0xff] }
   0x9   :  { %119 = vmatpush.msra.mxu1 %v71_v16  ;;  %159 = vmatpush.msra.mxu3 %v73_v17  ;;  %v63_v24 = vld [vmem:[%s487_s1 + $0x148] sm:$0xff]  ;;  %v65_v25 = vld [vmem:[%s487_s1 + $0x158] sm:$0xff]  ;;  %v54_v26 = vld [vmem:[%s487_s1 + $0x100] sm:$0xff] }
   0xa   :  { %100 = vmatpush.msra.mxu0 %v66_v13  ;;  %140 = vmatpush.msra.mxu2 %v68_v14  ;;  %v56_v27 = vld [vmem:[%s487_s1 + $0x110] sm:$0xff]  ;;  %v59_v28 = vld [vmem:[%s487_s1 + $0x128] sm:$0xff]  ;;  %v61_v29 = vld [vmem:[%s487_s1 + $0x138] sm:$0xff] }
   0xb   :  { %120 = vmatpush.msra.mxu1 %v67_v20  ;;  %160 = vmatpush.msra.mxu3 %v69_v21  ;;  %v50_v30 = vld [vmem:[%s487_s1 + $0xe0] sm:$0xff]  ;;  %v52_v31 = vld [vmem:[%s487_s1 + $0xf0] sm:$0xff]  ;;  %v55_v32 = vld [vmem:[%s487_s1 + $0x108] sm:$0xff] }
   0xc   :  { %101 = vmatpush.msra.mxu0 %v62_v18  ;;  %141 = vmatpush.msra.mxu2 %v64_v19  ;;  %v57_v33 = vld [vmem:[%s487_s1 + $0x118] sm:$0xff]  ;;  %v46_v34 = vld [vmem:[%s487_s1 + $0xc0] sm:$0xff]  ;;  %v48_v35 = vld [vmem:[%s487_s1 + $0xd0] sm:$0xff] }
   0xd   :  { %121 = vmatpush.msra.mxu1 %v63_v24  ;;  %161 = vmatpush.msra.mxu3 %v65_v25  ;;  %v51_v36 = vld [vmem:[%s487_s1 + $0xe8] sm:$0xff]  ;;  %v53_v37 = vld [vmem:[%s487_s1 + $0xf8] sm:$0xff]  ;;  %v42_v38 = vld [vmem:[%s487_s1 + $0xa0] sm:$0xff] }
   0xe   :  { %102 = vmatpush.msra.mxu0 %v58_v22  ;;  %142 = vmatpush.msra.mxu2 %v60_v23  ;;  %v44_v39 = vld [vmem:[%s487_s1 + $0xb0] sm:$0xff]  ;;  %v47_v40 = vld [vmem:[%s487_s1 + $0xc8] sm:$0xff]  ;;  %v49_v41 = vld [vmem:[%s487_s1 + $0xd8] sm:$0xff] }
   0xf   :  { %122 = vmatpush.msra.mxu1 %v59_v28  ;;  %162 = vmatpush.msra.mxu3 %v61_v29  ;;  %v38_v42 = vld [vmem:[%s487_s1 + $0x80] sm:$0xff]  ;;  %v40_v43 = vld [vmem:[%s487_s1 + $0x90] sm:$0xff]  ;;  %v43_v44 = vld [vmem:[%s487_s1 + $0xa8] sm:$0xff] }
  0x10   :  { %103 = vmatpush.msra.mxu0 %v54_v26  ;;  %143 = vmatpush.msra.mxu2 %v56_v27  ;;  %v45_v45 = vld [vmem:[%s487_s1 + $0xb8] sm:$0xff]  ;;  %v34_v46 = vld [vmem:[%s487_s1 + $0x60] sm:$0xff]  ;;  %v36_v47 = vld [vmem:[%s487_s1 + $0x70] sm:$0xff] }
  0x11   :  { %123 = vmatpush.msra.mxu1 %v55_v32  ;;  %163 = vmatpush.msra.mxu3 %v57_v33  ;;  %v39_v48 = vld [vmem:[%s487_s1 + $0x88] sm:$0xff]  ;;  %v41_v49 = vld [vmem:[%s487_s1 + $0x98] sm:$0xff]  ;;  %v30_v50 = vld [vmem:[%s487_s1 + $0x40] sm:$0xff] }
  0x12   :  { %104 = vmatpush.msra.mxu0 %v50_v30  ;;  %144 = vmatpush.msra.mxu2 %v52_v31  ;;  %v32_v51 = vld [vmem:[%s487_s1 + $0x50] sm:$0xff]  ;;  %v35_v52 = vld [vmem:[%s487_s1 + $0x68] sm:$0xff]  ;;  %v37_v53 = vld [vmem:[%s487_s1 + $0x78] sm:$0xff] }
  0x13   :  { %124 = vmatpush.msra.mxu1 %v51_v36  ;;  %164 = vmatpush.msra.mxu3 %v53_v37  ;;  %v26_v54 = vld [vmem:[%s487_s1 + $0x20] sm:$0xff]  ;;  %v28_v55 = vld [vmem:[%s487_s1 + $0x30] sm:$0xff]  ;;  %v31_v56 = vld [vmem:[%s487_s1 + $0x48] sm:$0xff] }
  0x14   :  { %105 = vmatpush.msra.mxu0 %v46_v34  ;;  %145 = vmatpush.msra.mxu2 %v48_v35  ;;  %v33_v57 = vld [vmem:[%s487_s1 + $0x58] sm:$0xff]  ;;  %v22_v58 = vld [vmem:[%s487_s1] sm:$0xff]  ;;  %v24_v59 = vld [vmem:[%s487_s1 + $0x10] sm:$0xff]  ;;  %v214_v35 = vstv %s491_s4 }
  0x15   :  { %125 = vmatpush.msra.mxu1 %v47_v40  ;;  %165 = vmatpush.msra.mxu3 %v49_v41  ;;  %v21_v60 = vld [vmem:[%s488_s0] sm:$0x3]  ;;  %v27_v61 = vld [vmem:[%s487_s1 + $0x28] sm:$0xff]  ;;  %v29_v62 = vld [vmem:[%s487_s1 + $0x38] sm:$0xff] }
  0x16   :  { %106 = vmatpush.msra.mxu0 %v42_v38  ;;  %146 = vmatpush.msra.mxu2 %v44_v39  ;;  %v23_v63 = vld [vmem:[%s487_s1 + $0x8] sm:$0xff]  ;;  %v25_v0 = vld [vmem:[%s487_s1 + $0x18] sm:$0xff]  ;;  %v86_v1 = vld [vmem:[%s489_s2] sm:$0xf] }
  0x17   :  { %126 = vmatpush.msra.mxu1 %v43_v44  ;;  %166 = vmatpush.msra.mxu3 %v45_v45  ;;  %v88_v2 = vperm.slane %v86_v1, 0  ;;  %v180_v3 = vld [vmem:[%s490_s3] sm:$0xf]  ;;  %v89_v6 = vperm.slane %v86_v1, 1  ;;  %v90_v9 = vperm.slane %v86_v1, 2  ;;  %v91_v15 = vperm.slane %v86_v1, 3 }
  0x18   :  { %107 = vmatpush.msra.mxu0 %v38_v42  ;;  %147 = vmatpush.msra.mxu2 %v40_v43  ;;  %v182_v7 = vperm.slane %v180_v3, 0  ;;  %v183_v13 = vperm.slane %v180_v3, 1  ;;  %v184_v19 = vperm.slane %v180_v3, 2  ;;  %v185_v25 = vperm.slane %v180_v3, 3 }
  0x19   :  { %127 = vmatpush.msra.mxu1 %v39_v48  ;;  %167 = vmatpush.msra.mxu3 %v41_v49 }
  0x1a   :  { %108 = vmatpush.msra.mxu0 %v34_v46  ;;  %148 = vmatpush.msra.mxu2 %v36_v47 }
  0x1b   :  { %128 = vmatpush.msra.mxu1 %v35_v52  ;;  %168 = vmatpush.msra.mxu3 %v37_v53 }
  0x1c   :  { %109 = vmatpush.msra.mxu0 %v30_v50  ;;  %149 = vmatpush.msra.mxu2 %v32_v51 }
  0x1d   :  { %129 = vmatpush.msra.mxu1 %v31_v56  ;;  %169 = vmatpush.msra.mxu3 %v33_v57 }
  0x1e   :  { %110 = vmatpush.msra.mxu0 %v26_v54  ;;  %150 = vmatpush.msra.mxu2 %v28_v55 }
  0x1f   :  { %130 = vmatpush.msra.mxu1 %v27_v61  ;;  %170 = vmatpush.msra.mxu3 %v29_v62 }
  0x20   :  { %111 = vmatpush.msra.mxu0 %v22_v58  ;;  %151 = vmatpush.msra.mxu2 %v24_v59 }
  0x21   :  { %112 = vmatmul.f32.vlgmr.msra.gmra.mxu0 %v21_v60  ;;  %152 = vmatmul.f32.vlgmr.msra.gmra.mxu2 %v21_v60 }
  0x22   :  { %131 = vmatpush.msra.mxu1 %v23_v63  ;;  %171 = vmatpush.msra.mxu3 %v25_v0 }
  0x23   :  { %132 = vmatmul.f32.vlgmr.msra.gmra.mxu1 %v21_v60  ;;  %172 = vmatmul.f32.vlgmr.msra.gmra.mxu3 %v21_v60 }
  0x9e   :  { %v113_v4 = vpop.f32.mrf.mxu0 }
  0x9f   :  { %v114_v5 = vadd.f32 %v113_v4, %v88_v2 }
  0xa0   :  { %v133_v10 = vpop.f32.mrf.mxu1 }
  0xa1   :  { %v176_v8 = vmax.f32 %v114_v5, 0.0  ;;  %v134_v11 = vadd.f32 %v133_v10, %v89_v6 }
  0xa3   :  { %v190_v12 = vmul.f32 %v182_v7, %v176_v8  ;;  %v177_v17 = vmax.f32 %v134_v11, 0.0 }
  0xa4   :  { %v153_v14 = vpop.f32.mrf.mxu2 }
  0xa5   :  { %v154_v16 = vadd.f32 %v153_v14, %v90_v9  ;;  %v195_v18 = vsel %vm194_vm0, %v190_v12, 0.0  ;;  %v191_v21 = vmul.f32 %v183_v13, %v177_v17 }
  0xa6   :  { %196 = vadd.xlane.f32.xlu0 %v195_v18  ;;  %v173_v22 = vpop.f32.mrf.mxu3 }
  0xa7   :  { %v178_v20 = vmax.f32 %v154_v16, 0.0  ;;  %v174_v23 = vadd.f32 %v173_v22, %v91_v15  ;;  %v198_v28 = vsel %vm194_vm0, %v191_v21, 0.0 }
  0xa9   :  { %v192_v24 = vmul.f32 %v184_v19, %v178_v20  ;;  %v179_v26 = vmax.f32 %v174_v23, 0.0 }
  0xab   :  { %v201_v27 = vsel %vm194_vm0, %v192_v24, 0.0  ;;  %v193_v29 = vmul.f32 %v185_v25, %v179_v26 }
  0xac   :  { %202 = vadd.xlane.f32.xlu1 %v201_v27 }
  0xad   :  { %v204_v30 = vsel %vm194_vm0, %v193_v29, 0.0 }
  0xae   :  { %199 = vadd.xlane.f32.xlu0 %v198_v28 }
  0xb4   :  { %205 = vadd.xlane.f32.xlu1 %v204_v30 }
 0x119   :  { %v197_v31 = vpop.xlane.xlu0 %196 }
 0x11f   :  { %v203_v32 = vpop.xlane.xlu1 %202 }
 0x121   :  { %v200_v33 = vpop.xlane.xlu0 %199 }
 0x122   :  { %v208_v34 = vsel %vm207_vm1, %v197_v31, %v200_v33 }
 0x123   :  { %v210_v37 = vsel %vm209_vm2, %v208_v34, %v203_v32 }
 0x127   :  { %v206_v36 = vpop.xlane.xlu1 %205 }
 0x128   :  { %v212_v38 = vsel %vm211_vm3, %v210_v37, %v206_v36 }
 0x129   :  { %v215_v39 = vadd.f32 %v214_v35, %v212_v38 }
 0x12b   :  { %v241_v40 = vmul.f32 -1.442695, %v215_v39 }
 0x12d   :  { %242 = vpow2.f32 %v241_v40 }
 0x133   :  { %v243_v41 = vpop.eup %242 }
 0x134   :  { %v219_v42 = vadd.f32 1.0, %v243_v41 }
 0x136   :  { %244 = vrcp.f32 %v219_v42  ;;  %v231_v46 = vand.u32 2147483648, %v219_v42  ;;  %v229_v48 = vand.u32 2147483647, %v219_v42  ;;  %vm225_vm5 = vweird.f32 %v219_v42 }
 0x138   :  { %v232_v50 = vor.u32 1.1754944e-38, %v231_v46  ;;  %vm230_vm8 = vcmp.eq.f32.partialorder %v229_v48, 8.507059e+37 }
 0x13c   :  { %v245_v43 = vpop.eup %244 }
 0x13d   :  { %v221_v44 = vmul.f32 %v245_v43, %v219_v42  ;;  %vm226_vm4 = vweird.f32 %v245_v43 }
 0x13e   :  { %vm227_vm7 = vmor %vm225_vm5, %vm226_vm4 }
 0x13f   :  { %v222_v45 = vsub.f32 1.0, %v221_v44 }
 0x141   :  { %v223_v47 = vmul.f32 %v245_v43, %v222_v45 }
 0x143   :  { %v224_v49 = vadd.f32 %v245_v43, %v223_v47 }
 0x145   :  { %v228_v51 = vsel %vm227_vm7, %v245_v43, %v224_v49 }
 0x146   :  { %v233_v52 = vsel %vm230_vm8, %v232_v50, %v228_v51 }
 0x147   :  { %236 = vst.msk [vmem:[%s492_s5] sm:$0x3] %vm235_vm6, %v233_v52 }

</bundles_post_ra>
